<compile_context>
chip_gen: v7x
topology: tpu7x:2x2x1
jax: 0.10.0
libtpu: 0.0.40
codegen_flags: <defaults>
</compile_context>

<pallas_src>
import functools

import jax
import jax.numpy as jnp
from jax.experimental import pallas as pl
from jax.experimental.pallas import tpu as pltpu


def _round_up(x, m):
    return (x + m - 1) // m * m


def _vmem_limit_bytes():
    """~3/4 of physical VMEM (48 MiB on v7x, 96 MiB on v5e/v6e), capped."""
    try:
        phys = pltpu.get_tpu_info().vmem_capacity_bytes
    except Exception:
        phys = 64 * 1024 * 1024  # conservative (v7x per-TC size)
    return min(int(phys * 3 // 4), 112 * 1024 * 1024)


def classifier_kernel(ts_ref, ew_ref, eb_ref, w1_ref, b1_ref, w2_ref, b2_ref,
                      o_ref, *, normalize):
    # --- encoder.encode(ts, normalize=normalize) ---
    # Mean-pool fused into the matmul: ts tile is (TB, T*D_in) bf16, ew_ref is
    # tile(enc_w,(T,1))*(1/T) in bf16.  f32 accumulation on the MXU.
    h = jnp.dot(ts_ref[...], ew_ref[...],
                preferred_element_type=jnp.float32) + eb_ref[...]   # (TB, out_dim) f32
    if normalize:
        # L2 normalize via EUP rsqrt (== h / max(||h||, 1e-12)).
        sumsq = jnp.sum(h * h, axis=-1, keepdims=True)
        h = h * jax.lax.rsqrt(jnp.maximum(sumsq, 1e-24))

    # --- classifier: linear_00 -> relu_00 -> linear_01 ---
    h1 = jnp.dot(h.astype(jnp.bfloat16), w1_ref[...],
                 preferred_element_type=jnp.float32) + b1_ref[...]  # (TB, n_dim)
    h1 = jnp.maximum(h1, 0.0)                                        # ReLU (f32)
    logit = jnp.dot(h1.astype(jnp.bfloat16), w2_ref[...],
                    preferred_element_type=jnp.float32) + b2_ref[...]  # (TB, N_pad)
    o_ref[...] = logit.astype(o_ref.dtype)


def classifier_forward(ts, params, normalize=True):
    """Fused Pallas forward. ts: (B, T, D_in) float32 -> (B, n_class) float32."""
    B, T, D_in = ts.shape
    TD = T * D_in
    out_dim = params["enc_w"].shape[1]
    n_dim = params["w1"].shape[1]
    n_class = params["w2"].shape[1]

    # ---- wrapper-side prep (one-time, outside the kernel) -------------------
    # Fuse mean-pool into the first matmul: (B, T*D_in) @ (T*D_in, out_dim).
    ts_flat = ts.reshape(B, TD).astype(jnp.bfloat16)
    enc_w_stacked = (jnp.tile(params["enc_w"], (T, 1)) *
                     (1.0 / T)).astype(jnp.bfloat16)            # (T*D_in, out_dim)
    enc_b = params["enc_b"].astype(jnp.float32)                 # (1, out_dim)
    w1 = params["w1"].astype(jnp.bfloat16)                      # (out_dim, n_dim)
    b1 = params["b1"].astype(jnp.float32)                       # (1, n_dim)
    # Lane-dense output: pad the last layer to a multiple of 128 columns.
    N_pad = _round_up(max(n_class, 1), 128)
    w2 = jnp.zeros((n_dim, N_pad), jnp.bfloat16).at[:, :n_class].set(
        params["w2"].astype(jnp.bfloat16))
    b2 = jnp.zeros((1, N_pad), jnp.float32).at[:, :n_class].set(
        params["b2"].astype(jnp.float32))

    # ---- batch-tile sizing against the VMEM budget ---------------------------
    vmem_limit = _vmem_limit_bytes()
    ts_budget = vmem_limit // 2                    # double-buffered ts tile <= half
    row_bytes = TD * 2                             # bf16 stream
    tb_cap = max(16, (ts_budget // (2 * row_bytes)) // 16 * 16)
    tb_cap = min(tb_cap, 1024)                     # per-step overhead already amortized

    num_tiles = max(1, -(-B // tb_cap))            # ceil(B / tb_cap)
    if B >= 32:
        # >=2 grid steps so the "parallel" batch axis shards across v7x's 2 TCs.
        num_tiles = max(num_tiles, 2)
    TB = _round_up(-(-B // num_tiles), 16)         # multiple of 16 (bf16 sublanes)
    B_pad = num_tiles * TB
    if B_pad != B:
        ts_flat = jnp.pad(ts_flat, ((0, B_pad - B), (0, 0)))  # zero rows, sliced off

    kernel = functools.partial(classifier_kernel, normalize=normalize)

    weight_bytes = (enc_w_stacked.size + w1.size + w2.size) * 2 \
                   + (enc_b.size + b1.size + b2.size) * 4
    cost = pl.CostEstimate(
        flops=2 * B_pad * (TD * out_dim + out_dim * n_dim + n_dim * N_pad),
        transcendentals=B_pad,  # one rsqrt per row
        bytes_accessed=2 * B_pad * TD + weight_bytes + 4 * B_pad * N_pad,
    )

    out = pl.pallas_call(
        kernel,
        out_shape=jax.ShapeDtypeStruct((B_pad, N_pad), jnp.float32),
        grid=(B_pad // TB,),
        in_specs=[
            # ts: one lane-dense batch tile per grid step (auto double-buffered).
            pl.BlockSpec((TB, TD), lambda i: (i, 0)),
            # Weights / biases: full blocks, constant index map -> stay resident.
            pl.BlockSpec((TD, out_dim), lambda i: (0, 0)),
            pl.BlockSpec((1, out_dim), lambda i: (0, 0)),
            pl.BlockSpec((out_dim, n_dim), lambda i: (0, 0)),
            pl.BlockSpec((1, n_dim), lambda i: (0, 0)),
            pl.BlockSpec((n_dim, N_pad), lambda i: (0, 0)),
            pl.BlockSpec((1, N_pad), lambda i: (0, 0)),
        ],
        out_specs=pl.BlockSpec((TB, N_pad), lambda i: (i, 0)),
        compiler_params=pltpu.CompilerParams(
            dimension_semantics=("parallel",),
            vmem_limit_bytes=vmem_limit,
        ),
        cost_estimate=cost,
    )(ts_flat, enc_w_stacked, enc_b, w1, b1, w2, b2)
    return out[:B, :n_class]


def init_params(key, d_in, out_dim, n_dim, n_class):
    """Deterministic parameter init (shapes follow the PyTorch module)."""
    k0, k1, k2, k3, k4, k5 = jax.random.split(key, 6)
    scale_e = 1.0 / jnp.sqrt(d_in)
    scale_1 = 1.0 / jnp.sqrt(out_dim)
    scale_2 = 1.0 / jnp.sqrt(n_dim)
    return {
        # synthetic encoder projection
        "enc_w": jax.random.uniform(k0, (d_in, out_dim), jnp.float32,
                                    -scale_e, scale_e),
        "enc_b": jax.random.uniform(k1, (1, out_dim), jnp.float32,
                                    -scale_e, scale_e),
        # classifier.linear_00  (out_dim -> n_dim)
        "w1": jax.random.uniform(k2, (out_dim, n_dim), jnp.float32,
                                 -scale_1, scale_1),
        "b1": jax.random.uniform(k3, (1, n_dim), jnp.float32,
                                 -scale_1, scale_1),
        # classifier.linear_01  (n_dim -> n_class)
        "w2": jax.random.uniform(k4, (n_dim, n_class), jnp.float32,
                                 -scale_2, scale_2),
        "b2": jax.random.uniform(k5, (1, n_class), jnp.float32,
                                 -scale_2, scale_2),
    }


def reference_forward(ts, params, normalize=True):
    """Pure-JAX f32 reference for correctness checking."""
    pooled = jnp.mean(ts, axis=1)
    h = pooled @ params["enc_w"] + params["enc_b"]
    if normalize:
        h = h / jnp.maximum(jnp.linalg.norm(h, axis=-1, keepdims=True), 1e-12)
    h1 = jnp.maximum(h @ params["w1"] + params["b1"], 0.0)
    return h1 @ params["w2"] + params["b2"]


if __name__ == "__main__":
    # Small shapes consistent with the module: batch=2, seq=8, feat=32,
    # encoder.out_dim=64, n_dim=64, n_class=10, n_layer=2.
    B, T, D_IN = 2, 8, 32
    OUT_DIM, N_DIM, N_CLASS = 64, 64, 10

    key = jax.random.PRNGKey(0)
    k_ts, k_params = jax.random.split(key)
    ts = jax.random.normal(k_ts, (B, T, D_IN), jnp.float32)
    params = init_params(k_params, D_IN, OUT_DIM, N_DIM, N_CLASS)

    logits = classifier_forward(ts, params, normalize=True)
    logits = jax.block_until_ready(logits)

    ref = reference_forward(ts, params, normalize=True)
    assert logits.shape == (B, N_CLASS)
    # bf16 MXU operands (f32 accumulation) -> slightly looser tolerance vs
    # the all-f32 reference.
    assert jnp.allclose(logits, ref, atol=2e-2, rtol=2e-2), "mismatch vs reference"

    print("KERNEL_OK")
</pallas_src>

<mosaic_0001>
module attributes {stable_mosaic.version = 11 : i64} {
  func.func @classifier_kernel(%arg0: i32, %arg1: memref<16x256xbf16, #tpu.memory_space<vmem>>, %arg2: memref<256x64xbf16, #tpu.memory_space<vmem>>, %arg3: memref<1x64xf32, #tpu.memory_space<vmem>>, %arg4: memref<64x64xbf16, #tpu.memory_space<vmem>>, %arg5: memref<1x64xf32, #tpu.memory_space<vmem>>, %arg6: memref<64x128xbf16, #tpu.memory_space<vmem>>, %arg7: memref<1x128xf32, #tpu.memory_space<vmem>>, %arg8: memref<16x128xf32, #tpu.memory_space<vmem>>) attributes {dimension_semantics = [#tpu.dimension_semantics<parallel>], iteration_bounds = array<i64: 1>, scalar_prefetch = 0 : i64, scratch_operands = 0 : i64, tpu.core_type = #tpu.core_type<tc>, window_params = [{transform_indices = @transform_0, window_bounds = array<i64: 16, 256>}, {pipeline_mode = #tpu.pipeline_mode<synchronous>, transform_indices = @transform_1, window_bounds = array<i64: 256, 64>}, {pipeline_mode = #tpu.pipeline_mode<synchronous>, transform_indices = @transform_2, window_bounds = array<i64: 1, 64>}, {pipeline_mode = #tpu.pipeline_mode<synchronous>, transform_indices = @transform_3, window_bounds = array<i64: 64, 64>}, {pipeline_mode = #tpu.pipeline_mode<synchronous>, transform_indices = @transform_4, window_bounds = array<i64: 1, 64>}, {pipeline_mode = #tpu.pipeline_mode<synchronous>, transform_indices = @transform_5, window_bounds = array<i64: 64, 128>}, {pipeline_mode = #tpu.pipeline_mode<synchronous>, transform_indices = @transform_6, window_bounds = array<i64: 1, 128>}, {transform_indices = @transform_7, window_bounds = array<i64: 16, 128>}]} {
    %c0 = arith.constant 0 : index
    %c0_0 = arith.constant 0 : index
    %0 = vector.load %arg1[%c0, %c0_0] : memref<16x256xbf16, #tpu.memory_space<vmem>>, vector<16x256xbf16>
    %c0_1 = arith.constant 0 : index
    %c0_2 = arith.constant 0 : index
    %1 = vector.load %arg2[%c0_1, %c0_2] : memref<256x64xbf16, #tpu.memory_space<vmem>>, vector<256x64xbf16>
    %cst = arith.constant dense<0.000000e+00> : vector<16x64xf32>
    %2 = tpu.matmul %0, %1, %cst {dimension_numbers = #tpu.dot_dimension_numbers<[1], [0], [0], [1], [0, 0, 1, 1], [], []>} : vector<16x256xbf16>, vector<256x64xbf16>, vector<16x64xf32> -> vector<16x64xf32>
    %c0_3 = arith.constant 0 : index
    %c0_4 = arith.constant 0 : index
    %3 = vector.load %arg3[%c0_3, %c0_4] : memref<1x64xf32, #tpu.memory_space<vmem>>, vector<1x64xf32>
    %4 = vector.broadcast %3 : vector<1x64xf32> to vector<16x64xf32>
    %5 = arith.addf %2, %4 : vector<16x64xf32>
    %6 = arith.mulf %5, %5 : vector<16x64xf32>
    %cst_5 = arith.constant dense<0.000000e+00> : vector<16xf32>
    %7 = vector.multi_reduction <add>, %6, %cst_5 [1] : vector<16x64xf32> to vector<16xf32>
    %8 = vector.shape_cast %7 : vector<16xf32> to vector<16x1xf32>
    %cst_6 = arith.constant 1.000000e-24 : f32
    %9 = vector.broadcast %cst_6 : f32 to vector<16x1xf32>
    %10 = arith.maximumf %8, %9 : vector<16x1xf32>
    %11 = math.rsqrt %10 : vector<16x1xf32>
    %12 = vector.broadcast %11 : vector<16x1xf32> to vector<16x64xf32>
    %13 = arith.mulf %5, %12 : vector<16x64xf32>
    %14 = arith.truncf %13 : vector<16x64xf32> to vector<16x64xbf16>
    %c0_7 = arith.constant 0 : index
    %c0_8 = arith.constant 0 : index
    %15 = vector.load %arg4[%c0_7, %c0_8] : memref<64x64xbf16, #tpu.memory_space<vmem>>, vector<64x64xbf16>
    %cst_9 = arith.constant dense<0.000000e+00> : vector<16x64xf32>
    %16 = tpu.matmul %14, %15, %cst_9 {dimension_numbers = #tpu.dot_dimension_numbers<[1], [0], [0], [1], [0, 0, 1, 1], [], []>} : vector<16x64xbf16>, vector<64x64xbf16>, vector<16x64xf32> -> vector<16x64xf32>
    %c0_10 = arith.constant 0 : index
    %c0_11 = arith.constant 0 : index
    %17 = vector.load %arg5[%c0_10, %c0_11] : memref<1x64xf32, #tpu.memory_space<vmem>>, vector<1x64xf32>
    %18 = vector.broadcast %17 : vector<1x64xf32> to vector<16x64xf32>
    %19 = arith.addf %16, %18 : vector<16x64xf32>
    %cst_12 = arith.constant 0.000000e+00 : f32
    %20 = vector.broadcast %cst_12 : f32 to vector<16x64xf32>
    %21 = arith.maximumf %19, %20 : vector<16x64xf32>
    %22 = arith.truncf %21 : vector<16x64xf32> to vector<16x64xbf16>
    %c0_13 = arith.constant 0 : index
    %c0_14 = arith.constant 0 : index
    %23 = vector.load %arg6[%c0_13, %c0_14] : memref<64x128xbf16, #tpu.memory_space<vmem>>, vector<64x128xbf16>
    %cst_15 = arith.constant dense<0.000000e+00> : vector<16x128xf32>
    %24 = tpu.matmul %22, %23, %cst_15 {dimension_numbers = #tpu.dot_dimension_numbers<[1], [0], [0], [1], [0, 0, 1, 1], [], []>} : vector<16x64xbf16>, vector<64x128xbf16>, vector<16x128xf32> -> vector<16x128xf32>
    %c0_16 = arith.constant 0 : index
    %c0_17 = arith.constant 0 : index
    %25 = vector.load %arg7[%c0_16, %c0_17] : memref<1x128xf32, #tpu.memory_space<vmem>>, vector<1x128xf32>
    %26 = vector.broadcast %25 : vector<1x128xf32> to vector<16x128xf32>
    %27 = arith.addf %24, %26 : vector<16x128xf32>
    %c0_18 = arith.constant 0 : index
    %c0_19 = arith.constant 0 : index
    %28 = vector.load %arg8[%c0_18, %c0_19] : memref<16x128xf32, #tpu.memory_space<vmem>>, vector<16x128xf32>
    tpu.vector_store %arg8[%c0_18, %c0_19], %27 {strides = array<i32>} : memref<16x128xf32, #tpu.memory_space<vmem>>, vector<16x128xf32>,
    return
  }
  func.func @transform_0(%arg0: i32) -> (i32, i32) {
    %c0_i32 = arith.constant 0 : i32
    %c0_i32_0 = arith.constant 0 : i32
    return %arg0, %c0_i32 : i32, i32
  }
  func.func @transform_1(%arg0: i32) -> (i32, i32) {
    %c0_i32 = arith.constant 0 : i32
    %c0_i32_0 = arith.constant 0 : i32
    %c0_i32_1 = arith.constant 0 : i32
    return %c0_i32, %c0_i32_0 : i32, i32
  }
  func.func @transform_2(%arg0: i32) -> (i32, i32) {
    %c0_i32 = arith.constant 0 : i32
    %c0_i32_0 = arith.constant 0 : i32
    %c0_i32_1 = arith.constant 0 : i32
    return %c0_i32, %c0_i32_0 : i32, i32
  }
  func.func @transform_3(%arg0: i32) -> (i32, i32) {
    %c0_i32 = arith.constant 0 : i32
    %c0_i32_0 = arith.constant 0 : i32
    %c0_i32_1 = arith.constant 0 : i32
    return %c0_i32, %c0_i32_0 : i32, i32
  }
  func.func @transform_4(%arg0: i32) -> (i32, i32) {
    %c0_i32 = arith.constant 0 : i32
    %c0_i32_0 = arith.constant 0 : i32
    %c0_i32_1 = arith.constant 0 : i32
    return %c0_i32, %c0_i32_0 : i32, i32
  }
  func.func @transform_5(%arg0: i32) -> (i32, i32) {
    %c0_i32 = arith.constant 0 : i32
    %c0_i32_0 = arith.constant 0 : i32
    %c0_i32_1 = arith.constant 0 : i32
    return %c0_i32, %c0_i32_0 : i32, i32
  }
  func.func @transform_6(%arg0: i32) -> (i32, i32) {
    %c0_i32 = arith.constant 0 : i32
    %c0_i32_0 = arith.constant 0 : i32
    %c0_i32_1 = arith.constant 0 : i32
    return %c0_i32, %c0_i32_0 : i32, i32
  }
  func.func @transform_7(%arg0: i32) -> (i32, i32) {
    %c0_i32 = arith.constant 0 : i32
    %c0_i32_0 = arith.constant 0 : i32
    return %arg0, %c0_i32 : i32, i32
  }
}

</mosaic_0001>

<bundles_post_ra>
// kernel: tpu_custom_call.1
= control target key start
LH: loop header
LB: loop body
LE: loop exit
PB: predicated region body
PF: predicated region fallthrough
CT: control target
= control target key end

     0   :  { %s716_s0 = inlined_call_operand.vmem [shape: bf16[16,256], index: 0, kind: input, shape index: {}]   ;;  %s717_s1 = inlined_call_operand.vmem [shape: bf16[256,64], index: 1, kind: input, shape index: {}]   ;;  %s718_s2 = inlined_call_operand.vmem [shape: f32[1,64], index: 2, kind: input, shape index: {}]   ;;  %s719_s3 = inlined_call_operand.vmem [shape: bf16[64,64], index: 3, kind: input, shape index: {}]   ;;  %s720_s4 = inlined_call_operand.vmem [shape: f32[1,64], index: 4, kind: input, shape index: {}]   ;;  %s721_s5 = inlined_call_operand.vmem [shape: bf16[64,128], index: 5, kind: input, shape index: {}]   ;;  %s722_s6 = inlined_call_operand.vmem [shape: f32[1,128], index: 6, kind: input, shape index: {}]   ;;  %s723_s7 = inlined_call_operand.hbm [shape: f32[16,128], index: 7, kind: output, shape index: {}]  }
   0x1   :  { %v511_v0 = vld [vmem:[%s717_s1 + $0x40] sm:$0xff]   ;;  %v513_v2 = vld [vmem:[%s717_s1 + $0x48] sm:$0xff]   ;;  %v515_v4 = vld [vmem:[%s717_s1 + $0x50] sm:$0xff]  }
   0x2   :  { %v512_v1 = vld [vmem:[%s717_s1] sm:$0xff]   ;;  %450 = vmatprep.subr.bf16.mxu0 %v511_v0  ;;  %v514_v3 = vld [vmem:[%s717_s1 + $0x8] sm:$0xff]   ;;  %v516_v5 = vld [vmem:[%s717_s1 + $0x10] sm:$0xff]  }
   0x3   :  { %451 = vmatpush3.bf16.msra.mxu0 %v512_v1  ;;  %v517_v6 = vld [vmem:[%s717_s1 + $0x58] sm:$0xff]   ;;  %v519_v8 = vld [vmem:[%s717_s1 + $0x60] sm:$0xff]   ;;  %v521_v10 = vld [vmem:[%s717_s1 + $0x68] sm:$0xff]  }
   0x4   :  { %452 = vmatprep.subr.bf16.mxu0 %v513_v2  ;;  %v518_v7 = vld [vmem:[%s717_s1 + $0x18] sm:$0xff]   ;;  %v520_v9 = vld [vmem:[%s717_s1 + $0x20] sm:$0xff]   ;;  %v522_v11 = vld [vmem:[%s717_s1 + $0x28] sm:$0xff]  }
   0x5   :  { %v529_v12 = vld [vmem:[%s716_s0 + $0x4] ss:$8 sps:$4 sm:$0xff]   ;;  %v523_v13 = vld [vmem:[%s717_s1 + $0x70] sm:$0xff]  }
   0x6   :  { %207 = vmatprep.mubr.bf16.mxu0 %v529_v12 }
   0x7   :  { %453 = vmatpush3.bf16.msra.mxu0 %v514_v3 }
   0x8   :  { %454 = vmatprep.subr.bf16.mxu0 %v515_v4 }
   0xb   :  { %455 = vmatpush3.bf16.msra.mxu0 %v516_v5 }
   0xc   :  { %456 = vmatprep.subr.bf16.mxu0 %v517_v6 }
   0xf   :  { %457 = vmatpush3.bf16.msra.mxu0 %v518_v7 }
  0x10   :  { %458 = vmatprep.subr.bf16.mxu0 %v519_v8 }
  0x13   :  { %459 = vmatpush3.bf16.msra.mxu0 %v520_v9 }
  0x14   :  { %460 = vmatprep.subr.bf16.mxu0 %v521_v10 }
  0x15   :  { %12 = vsyncpa [#allocation3], 0  ;;  %v524_v14 = vld [vmem:[%s717_s1 + $0x30] sm:$0xff]   ;;  %v525_v15 = vld [vmem:[%s717_s1 + $0x78] sm:$0xff]   ;;  %vm218_vm0 = vcmask 523264   ;;  %v566_v32 = vmov 0.0  }
  0x16   :  { %v526_v16 = vld [vmem:[%s717_s1 + $0x38] sm:$0xff]   ;;  %v527_v17 = vld [vmem:[%s716_s0] ss:$8 sps:$4 sm:$0xff]   ;;  %482 = vmatprep.subr.bf16.mxu1 %v566_v32  ;;  %vm567_vm1 = vmmov 0   ;;  %v532_v34 = vld [vmem:[%s719_s3 + $0x10] sm:$0xff]  }
  0x17   :  { %461 = vmatpush3.bf16.msra.mxu0 %v522_v11  ;;  %v419_v19 = vld [vmem:[%s718_s2] ss:$0 sm:$0xff]  ;;  %v531_v33 = vld [vmem:[%s719_s3 + $0x8] sm:$0xff]   ;;  %490 = vmatprep.mubr.msk.bf16.mxu1 %vm567_vm1, %v566_v32  ;;  %v533_v35 = vld [vmem:[%s719_s3 + $0x18] sm:$0xff]  }
  0x18   :  { %462 = vmatprep.subr.bf16.mxu0 %v523_v13  ;;  %v530_v31 = vld [vmem:[%s719_s3] sm:$0xff]   ;;  %v535_v46 = vld [vmem:[%s721_s5 + $0x8] sm:$0xff]   ;;  %v536_v47 = vld [vmem:[%s721_s5 + $0x10] sm:$0xff]  }
  0x19   :  { %483 = vmatpush3.bf16.msra.mxu1 %v530_v31  ;;  %v534_v44 = vld [vmem:[%s721_s5] sm:$0xff]   ;;  %v537_v48 = vld [vmem:[%s721_s5 + $0x18] sm:$0xff]   ;;  %s568_s5 = smov [#allocation2]  }
  0x1a   :  { %484 = vmatprep.subr.bf16.mxu1 %v566_v32  ;;  %v438_v49 = vld [vmem:[%s720_s4] ss:$0 sm:$0xff]  ;;  %s408_s9 = sshll.u32 %s568_s5, 4  ;;  %s409_s9 = int_to_ptr.vmem [resolvable:$true] %s408_s9 }
  0x1b   :  { %463 = vmatpush3.bf16.msra.mxu0 %v524_v14  ;;  %v444_v59 = vld [vmem:[%s722_s6] ss:$0 sm:$0xff]  ;;  %s542_s4 = scalar_lea.vmem %s409_s9, 256  ;;  %p547_p1 = scmp.lt.s32.totalorder %s409_s9, %s409_s9 }
  0x1c   :  { %464 = vmatprep.subr.bf16.mxu0 %v525_v15  ;;  %p543_p0 = scmp.ne.s32.totalorder %s409_s9, %s542_s4  ;;  %p548_p2 = scmp.lt.s32.totalorder %s542_s4, %s542_s4 }
  0x1d   :  { %485 = vmatpush3.bf16.msra.mxu1 %v531_v33 }
  0x1e   :  { %486 = vmatprep.subr.bf16.mxu1 %v566_v32  ;;  %p549_p3 = por %p548_p2, %p547_p1 }
  0x1f   :  { %465 = vmatpush3.bf16.msra.mxu0 %v526_v16 }
  0x20   :  { %p550_p4 = pnand %p549_p3, %p543_p0 }
  0x21   :  { %487 = vmatpush3.bf16.msra.mxu1 %v532_v34 }
  0x22   :  { %208 = vmatmul.mubr.bf16.vlgmr.msra.gmra.mrb[0].mxu0 %v527_v17  ;;  %488 = vmatprep.subr.bf16.mxu1 %v566_v32 }
  0x25   :  { %489 = vmatpush3.bf16.msra.mxu1 %v533_v35 }
  0x26   :  { %494 = vmatprep.subr.bf16.mxu1 %v566_v32 }
  0xf5   :  { %v466_v18 = vpop.f32.mrb[0].mxu0 }
  0xf6   :  { %v467_v20 = vpop.f32.mrb[1].mxu0 }
  0xf7   :  { %v468_v21 = vadd.f32 %v467_v20, %v466_v18  ;;  %v469_v22 = vpop.f32.mrb[2].mxu0 }
  0xf8   :  { %v470_v23 = vpop.f32.mrb[3].mxu0 }
  0xf9   :  { %v210_v24 = vadd.f32 %v468_v21, %v419_v19  ;;  %v471_v25 = vadd.f32 %v470_v23, %v469_v22 }
  0xfb   :  { %v213_v26 = vadd.f32 %v471_v25, %v419_v19  ;;  %v216_v27 = vmul.f32 %v210_v24, %v210_v24 }
  0xfd   :  { %v219_v28 = vsel %vm218_vm0, %v216_v27, 0.0  ;;  %v217_v29 = vmul.f32 %v213_v26, %v213_v26 }
  0xfe   :  { %220 = vadd.xlane.f32.xlu0 %v219_v28 }
  0xff   :  { %v222_v30 = vsel %vm218_vm0, %v217_v29, 0.0 }
 0x102   :  { %223 = vadd.xlane.f32.xlu0 %v222_v30 }
 0x18b   :  { %v221_v36 = vpop.xlane.xlu0 %220 }
 0x18c   :  { %v225_v37 = vmax.f32 %v221_v36, 1e-24 }
 0x18e   :  { %538 = vrsqrt.f32 %v225_v37 }
 0x18f   :  { %v224_v38 = vpop.xlane.xlu0 %223 }
 0x190   :  { %v226_v39 = vmax.f32 %v224_v38, 1e-24 }
 0x192   :  { %540 = vrsqrt.f32 %v226_v39 }
 0x198   :  { %v539_v40 = vpop.eup %538 }
 0x199   :  { %v229_v42 = vmul.f32 %v539_v40, %v210_v24 }
 0x19c   :  { %v541_v41 = vpop.eup %540 }
 0x19d   :  { %v230_v43 = vmul.f32 %v541_v41, %v213_v26 }
 0x19f   :  { %v231_v45 = vpack.c.bf16 %v230_v43, %v229_v42 }
 0x1a1   :  { %491 = vmatmul.mubr.msk.bf16.vlgmr.msra.gmra.mrb[0].mxu1 %vm218_vm0, %v231_v45 }
 0x1a2   :  { %495 = vmatpush3.bf16.msra.mxu1 %v534_v44  ;;  %502 = vmatprep.mubr.msk.bf16.mxu1 %vm567_vm1, %v566_v32 }
 0x1a3   :  { %496 = vmatprep.subr.bf16.mxu1 %v566_v32 }
 0x1a6   :  { %497 = vmatpush3.bf16.msra.mxu1 %v535_v46 }
 0x1a7   :  { %498 = vmatprep.subr.bf16.mxu1 %v566_v32 }
 0x1aa   :  { %499 = vmatpush3.bf16.msra.mxu1 %v536_v47 }
 0x1ab   :  { %500 = vmatprep.subr.bf16.mxu1 %v566_v32 }
 0x1ae   :  { %501 = vmatpush3.bf16.msra.mxu1 %v537_v48 }
 0x274   :  { %v308_v50 = vpop.f32.mrb[0].mxu1 }
 0x275   :  { %v309_v51 = vadd.f32 %v438_v49, %v308_v50  ;;  %v492_v52 = vpop.f32.mrb[1].mxu1 }
 0x276   :  { %v311_v53 = vpop.f32.mrb[2].mxu1 }
 0x277   :  { %v312_v54 = vadd.f32 %v438_v49, %v311_v53  ;;  %v493_v55 = vpop.f32.mrb[3].mxu1  ;;  %v315_v56 = vmax.f32 %v309_v51, 0.0 }
 0x279   :  { %v316_v57 = vmax.f32 %v312_v54, 0.0 }
 0x27b   :  { %v317_v58 = vpack.c.bf16 %v316_v57, %v315_v56 }
 0x27d   :  { %503 = vmatmul.mubr.msk.bf16.vlgmr.msra.gmra.mrb[4].mxu1 %vm218_vm0, %v317_v58 }
 0x350   :  { %v394_v60 = vpop.f32.mrb[4].mxu1 }
 0x351   :  { %v395_v61 = vadd.f32 %v444_v59, %v394_v60  ;;  %v504_v62 = vpop.f32.mrb[5].mxu1 }
 0x352   :  { %v397_v63 = vpop.f32.mrb[6].mxu1 }
 0x353   :  { %401 = vst [vmem:[#allocation2] sm:$0xff] %v395_v61  ;;  %v398_v0 = vadd.f32 %v444_v59, %v397_v63  ;;  %v505_v1 = vpop.f32.mrb[7].mxu1 }
 0x355   :  { %402 = vst [vmem:[#allocation2 + $0x8] sm:$0xff] %v398_v0 }
 0x356   :  { %553 = shalt.err (!%p550_p4)
}
 0x357   :  { %s554_s11 = scalar_lea.hbm %s723_s7, 256 }
 0x358   :  { %p555_p5 = scmp.ne.s32.totalorder %s723_s7, %s554_s11  ;;  %p558_p6 = scmp.lt.u32.totalorder %s554_s11, %s723_s7 }
 0x35a   :  { %p560_p7 = pnand %p558_p6, %p555_p5 }
 0x35c   :  { %563 = shalt.err (!%p560_p7)
}
 0x35d   :  { %s569_s0 = smov 128   ;;  %s570_s1 = smov 8  }
 0x35e   :  { %414 = dma.vmem_to_hbm [thread:$0]  %s409_s9, 256, %s723_s7, [#allocation3], %s569_s0, %s569_s0, %s570_s1  }
 0x35f   :  { %564 = dma.done.wait [#allocation3], 256  }
 0x360   :  { %565 = vsyncadd [#allocation3], 4294967040 }
 0x361   :  { %418 = vsyncpa [#allocation3], 1 }

</bundles_post_ra>
